<compile_context>
chip_gen: v6e
topology: v6e:2x2x1
jax: 0.10.0
libtpu: 0.0.40
codegen_flags: <defaults>
</compile_context>

<pallas_src>
import jax
import jax.numpy as jnp
from jax.experimental import pallas as pl
from jax.experimental.pallas import tpu as pltpu


_LANE = 128
# 2 MiB per block buffer; with double-buffered input + output that is ~8 MiB of
# scoped VMEM, safe on every generation's default scoped-VMEM limit.
_PER_BUFFER_BYTES = 2 << 20
# Below this element count the plain jnp expression beats a pallas_call.
_SMALL_INPUT_THRESHOLD = 64 * 1024


def _make_soft_clip_kernel(inv_bound: float):
    """Build an elementwise soft-clip kernel with `bound` baked in as a constant."""
    inv_bound = float(inv_bound)

    def kernel(flux_ref, out_ref):
        f = flux_ref[...].astype(jnp.float32)   # f32 math keeps bf16 inputs correct on v5e
        out_ref[...] = (f / (1.0 + jnp.abs(f * inv_bound))).astype(out_ref.dtype)

    return kernel


def _sublane_granule(dtype) -> int:
    """Sublane granule per dtype packing (f32: 8, bf16/f16: 16, int8/fp8: 32)."""
    return {4: 8, 2: 16, 1: 32}.get(jnp.dtype(dtype).itemsize, 8)


def _choose_blocks(B: int, N: int, itemsize: int, sublane: int, budget: int):
    """Pick (block_rows, block_cols): full lane width whenever it fits the budget."""
    if N * itemsize * sublane <= budget:
        block_cols = N                           # full-width -> one contiguous DMA slab
    else:
        # Extremely wide rows: lane-aligned column tile that keeps one sublane
        # granule of rows within the budget.
        block_cols = max((budget // (sublane * itemsize) // _LANE) * _LANE, _LANE)
        block_cols = min(block_cols, N)
    row_budget = max(budget // (block_cols * itemsize), 1)
    if B <= row_budget:
        block_rows = B                           # full-extent block: always legal
    else:
        block_rows = max((row_budget // sublane) * sublane, sublane)
    return block_rows, block_cols


def _soft_clip_2d(flux2d: jax.Array, inv_bound: float) -> jax.Array:
    """Run the Pallas kernel on a 2-D flux array."""
    B, N = flux2d.shape
    itemsize = jnp.dtype(flux2d.dtype).itemsize
    sublane = _sublane_granule(flux2d.dtype)
    block_rows, block_cols = _choose_blocks(B, N, itemsize, sublane, _PER_BUFFER_BYTES)
    grid = (pl.cdiv(B, block_rows), pl.cdiv(N, block_cols))

    return pl.pallas_call(
        _make_soft_clip_kernel(inv_bound),
        out_shape=jax.ShapeDtypeStruct((B, N), flux2d.dtype),
        grid=grid,
        in_specs=[pl.BlockSpec((block_rows, block_cols), lambda i, j: (i, j))],
        out_specs=pl.BlockSpec((block_rows, block_cols), lambda i, j: (i, j)),
        compiler_params=pltpu.CompilerParams(
            dimension_semantics=("parallel", "parallel")),
    )(flux2d)


def soft_clip_flux_kernel(flux: jax.Array, bound: float = 100.0,
                          *, small_input_threshold: int = _SMALL_INPUT_THRESHOLD
                          ) -> jax.Array:
    """Soft-clip an arbitrary-shaped flux array."""
    bound = float(bound)
    total = int(flux.size)
    orig_shape = flux.shape

    # Tiny-input fast path: launch overhead dominates and XLA can fuse this.
    if total == 0 or total < small_input_threshold:
        return flux / (1.0 + jnp.abs(flux / bound))

    inv_bound = 1.0 / bound

    # 2-D+ arrays with a lane-friendly last dim: tile rows, full-width columns.
    if flux.ndim >= 2 and orig_shape[-1] >= _LANE:
        flux2d = flux.reshape(-1, orig_shape[-1])
        return _soft_clip_2d(flux2d, inv_bound).reshape(orig_shape)

    # 1-D (or skinny-last-dim) arrays: refold into sublane-dense (rows, C) tiles
    # instead of a (1, total) strip.
    flat = flux.reshape(-1)
    cols = next((c for c in (4096, 2048, 1024, 512, 256, 128) if total % c == 0), None)
    if cols is not None:
        out = _soft_clip_2d(flat.reshape(-1, cols), inv_bound).reshape(-1)
    else:
        cols = 1024
        padded_len = pl.cdiv(total, cols) * cols
        padded = jnp.pad(flat, (0, padded_len - total))   # soft-clip(0) == 0, sliced off anyway
        out = _soft_clip_2d(padded.reshape(-1, cols), inv_bound).reshape(-1)[:total]
    return out.reshape(orig_shape)


def soft_clip_flux_forward(x: dict, bound: float = 100.0) -> dict:
    """Dict-in / dict-out wrapper mirroring SoftClipFlux.forward."""
    output = dict(x)
    output["flux"] = soft_clip_flux_kernel(x["flux"], bound)
    return output


def _ref(flux, bound=100.0):
    return flux / (1.0 + jnp.abs(flux / bound))


if __name__ == "__main__":
    key = jax.random.PRNGKey(0)
    k_theta, k_flux, k_wlen, k_big, k_1d, k_odd, k_bf16 = jax.random.split(key, 7)

    # --- small dict input, matching the module's typical use (hits the fast path) ---
    batch, n_bins, n_theta = 8, 256, 16
    x = {
        "theta": jax.random.normal(k_theta, (batch, n_theta), dtype=jnp.float32),
        "flux": 500.0 * jax.random.normal(k_flux, (batch, n_bins), dtype=jnp.float32),
        "wlen": jnp.tile(jnp.linspace(0.95, 2.45, n_bins, dtype=jnp.float32), (batch, 1)),
    }
    out = soft_clip_flux_forward(x, bound=100.0)
    jax.block_until_ready(out["flux"])
    assert out["flux"].shape == x["flux"].shape and out["flux"].dtype == x["flux"].dtype
    assert jnp.allclose(out["flux"], _ref(x["flux"]), atol=1e-6, rtol=1e-6)
    assert jnp.array_equal(out["theta"], x["theta"])
    assert jnp.array_equal(out["wlen"], x["wlen"])

    # --- 2-D Pallas path (above the small-input threshold, full-width blocks) ---
    big = 300.0 * jax.random.normal(k_big, (128, 1024), dtype=jnp.float32)
    big_out = soft_clip_flux_kernel(big, bound=100.0)
    jax.block_until_ready(big_out)
    assert jnp.allclose(big_out, _ref(big), atol=1e-6, rtol=1e-6)

    # --- 1-D Pallas path with a ragged tail (refold + pad + slice-back) ---
    flat = 200.0 * jax.random.normal(k_1d, (70_001,), dtype=jnp.float32)
    flat_out = soft_clip_flux_kernel(flat, bound=100.0)
    jax.block_until_ready(flat_out)
    assert flat_out.shape == flat.shape
    assert jnp.allclose(flat_out, _ref(flat), atol=1e-6, rtol=1e-6)

    # --- non-(8,128)-aligned shape, kernel path forced (full-dim blocks) ---
    odd = 300.0 * jax.random.normal(k_odd, (5, 300), dtype=jnp.float32)
    odd_out = soft_clip_flux_kernel(odd, bound=100.0, small_input_threshold=0)
    jax.block_until_ready(odd_out)
    assert jnp.allclose(odd_out, _ref(odd), atol=1e-6, rtol=1e-6)

    # --- bf16 input exercises the 16-row sublane granule; math still in f32 ---
    bf = (300.0 * jax.random.normal(k_bf16, (128, 1024), dtype=jnp.float32)).astype(jnp.bfloat16)
    bf_out = soft_clip_flux_kernel(bf, bound=100.0)
    jax.block_until_ready(bf_out)
    assert bf_out.dtype == jnp.bfloat16
    assert jnp.allclose(bf_out.astype(jnp.float32),
                        _ref(bf.astype(jnp.float32)), atol=1e-2, rtol=1e-2)

    print("KERNEL_OK")
</pallas_src>

<mosaic_0001>
module attributes {stable_mosaic.version = 11 : i64} {
  func.func @kernel(%arg0: i32, %arg1: i32, %arg2: memref<128x1024xf32, #tpu.memory_space<vmem>>, %arg3: memref<128x1024xf32, #tpu.memory_space<vmem>>) attributes {dimension_semantics = [#tpu.dimension_semantics<parallel>, #tpu.dimension_semantics<parallel>], iteration_bounds = array<i64: 1, 1>, scalar_prefetch = 0 : i64, scratch_operands = 0 : i64, tpu.core_type = #tpu.core_type<tc>, window_params = [{transform_indices = @transform_0, window_bounds = array<i64: 128, 1024>}, {transform_indices = @transform_1, window_bounds = array<i64: 128, 1024>}]} {
    %c0 = arith.constant 0 : index
    %c0_0 = arith.constant 0 : index
    %0 = vector.load %arg2[%c0, %c0_0] : memref<128x1024xf32, #tpu.memory_space<vmem>>, vector<128x1024xf32>
    %cst = arith.constant 0.00999999977 : f32
    %1 = vector.broadcast %cst : f32 to vector<128x1024xf32>
    %2 = arith.mulf %0, %1 : vector<128x1024xf32>
    %3 = math.absf %2 : vector<128x1024xf32>
    %cst_1 = arith.constant 1.000000e+00 : f32
    %4 = vector.broadcast %cst_1 : f32 to vector<128x1024xf32>
    %5 = arith.addf %4, %3 : vector<128x1024xf32>
    %6 = arith.divf %0, %5 : vector<128x1024xf32>
    %c0_2 = arith.constant 0 : index
    %c0_3 = arith.constant 0 : index
    %7 = vector.load %arg3[%c0_2, %c0_3] : memref<128x1024xf32, #tpu.memory_space<vmem>>, vector<128x1024xf32>
    tpu.vector_store %arg3[%c0_2, %c0_3], %6 {strides = array<i32>} : memref<128x1024xf32, #tpu.memory_space<vmem>>, vector<128x1024xf32>,
    return
  }
  func.func @transform_0(%arg0: i32, %arg1: i32) -> (i32, i32) {
    %c0_i32 = arith.constant 0 : i32
    return %arg0, %arg1 : i32, i32
  }
  func.func @transform_1(%arg0: i32, %arg1: i32) -> (i32, i32) {
    %c0_i32 = arith.constant 0 : i32
    return %arg0, %arg1 : i32, i32
  }
}

</mosaic_0001>

<bundles_post_ra>
// kernel: tpu_custom_call.1
= control target key start
LH: loop header
LB: loop body
LE: loop exit
PB: predicated region body
PF: predicated region fallthrough
CT: control target
= control target key end

     0   :  { %6 = vsyncpa [#allocation3], 0  ;;  %s1778_s0 = inlined_call_operand.hbm [shape: f32[128,1024], index: 0, kind: input, shape index: {}]   ;;  %s1779_s1 = inlined_call_operand.hbm [shape: f32[128,1024], index: 1, kind: output, shape index: {}]  }
   0x1   :  { %7 = vsyncpa [#allocation4], 0  ;;  %s1240_s6 = smov [#allocation2]  }
   0x2   :  { %s13_s7 = sshll.u32 %s1240_s6, 4  ;;  %s14_s7 = int_to_ptr.vmem [resolvable:$true] %s13_s7 }
   0x3   :  { %s1204_s8 = scalar_lea.vmem %s14_s7, 16384  ;;  %p1209_p1 = scmp.lt.s32.totalorder %s14_s7, %s14_s7 }
   0x4   :  { %p1205_p0 = scmp.ne.s32.totalorder %s14_s7, %s1204_s8  ;;  %p1210_p2 = scmp.lt.s32.totalorder %s1204_s8, %s1204_s8 }
   0x6   :  { %p1211_p3 = por %p1210_p2, %p1209_p1 }
   0x8   :  { %p1212_p4 = pnand %p1211_p3, %p1205_p0 }
   0xa   :  { %1215 = shalt.err (!%p1212_p4)
}
   0xb   :  { %s1241_s9 = smov 1024   ;;  %s1242_s10 = smov 64  }
   0xc   :  { %19 = dma.hbm_to_vmem [thread:$0]  %s1778_s0, 16384, %s14_s7, [#allocation3], %s1241_s9, %s1241_s9, %s1242_s10  }
   0xd   :  { %1236 = dma.done.wait [#allocation3], 16384  }
   0xe   :  { %1237 = vsyncadd [#allocation3], 4294950912  ;;  %v1260_v0 = vld [vmem:[#allocation2] sm:$0xff]  ;;  %v1262_v1 = vld [vmem:[#allocation2 + $0x8] sm:$0xff]  ;;  %s1243_s0 = smov [#allocation5]  }
   0xf   :  { %v1264_v2 = vld [vmem:[#allocation2 + $0x10] sm:$0xff]  ;;  %v151_v3 = vmul.f32 0.01, %v1260_v0  ;;  %v152_v4 = vmul.f32 0.01, %v1262_v1  ;;  %v1269_v6 = vld [vmem:[#allocation2 + $0x18] sm:$0xff] }
  0x10   :  { %v153_v5 = vmul.f32 0.01, %v1264_v2  ;;  %v1271_v7 = vld [vmem:[#allocation2 + $0x20] sm:$0xff]  ;;  %v1273_v8 = vld [vmem:[#allocation2 + $0x28] sm:$0xff]  ;;  %v154_v12 = vmul.f32 0.01, %v1269_v6 }
  0x11   :  { %v279_v9 = vand.u32 2147483647, %v151_v3  ;;  %v280_v10 = vand.u32 2147483647, %v152_v4  ;;  %v155_v13 = vmul.f32 0.01, %v1271_v7 }
  0x12   :  { %v281_v11 = vand.u32 2147483647, %v153_v5  ;;  %v156_v14 = vmul.f32 0.01, %v1273_v8  ;;  %v1278_v18 = vld [vmem:[#allocation2 + $0x30] sm:$0xff]  ;;  %v1280_v19 = vld [vmem:[#allocation2 + $0x38] sm:$0xff] }
  0x13   :  { %v407_v15 = vadd.f32 1.0, %v279_v9  ;;  %v408_v16 = vadd.f32 1.0, %v280_v10  ;;  %v1282_v20 = vld [vmem:[#allocation2 + $0x40] sm:$0xff]  ;;  %v282_v21 = vand.u32 2147483647, %v154_v12  ;;  %v1287_v30 = vld [vmem:[#allocation2 + $0x48] sm:$0xff] }
  0x14   :  { %v409_v17 = vadd.f32 1.0, %v281_v11  ;;  %v283_v22 = vand.u32 2147483647, %v155_v13  ;;  %v284_v23 = vand.u32 2147483647, %v156_v14  ;;  %v1289_v31 = vld [vmem:[#allocation2 + $0x50] sm:$0xff] }
  0x15   :  { %940 = vrcp.f32 %v407_v15  ;;  %v157_v24 = vmul.f32 0.01, %v1278_v18  ;;  %v158_v25 = vmul.f32 0.01, %v1280_v19  ;;  %v159_v26 = vmul.f32 0.01, %v1282_v20 }
  0x16   :  { %942 = vrcp.f32 %v408_v16  ;;  %v410_v27 = vadd.f32 1.0, %v282_v21  ;;  %v411_v28 = vadd.f32 1.0, %v283_v22  ;;  %v412_v29 = vadd.f32 1.0, %v284_v23  ;;  %v1291_v32 = vld [vmem:[#allocation2 + $0x58] sm:$0xff]  ;;  %v1296_v42 = vld [vmem:[#allocation2 + $0x60] sm:$0xff]  ;;  %v1298_v43 = vld [vmem:[#allocation2 + $0x68] sm:$0xff] }
  0x17   :  { %944 = vrcp.f32 %v409_v17  ;;  %v285_v33 = vand.u32 2147483647, %v157_v24  ;;  %v286_v34 = vand.u32 2147483647, %v158_v25  ;;  %v287_v35 = vand.u32 2147483647, %v159_v26 }
  0x18   :  { %946 = vrcp.f32 %v410_v27  ;;  %v160_v36 = vmul.f32 0.01, %v1287_v30  ;;  %v161_v37 = vmul.f32 0.01, %v1289_v31  ;;  %v162_v38 = vmul.f32 0.01, %v1291_v32 }
  0x19   :  { %948 = vrcp.f32 %v411_v28  ;;  %v413_v39 = vadd.f32 1.0, %v285_v33  ;;  %v414_v40 = vadd.f32 1.0, %v286_v34  ;;  %v415_v41 = vadd.f32 1.0, %v287_v35  ;;  %v1300_v44 = vld [vmem:[#allocation2 + $0x70] sm:$0xff]  ;;  %v1305_v54 = vld [vmem:[#allocation2 + $0x78] sm:$0xff]  ;;  %v1307_v55 = vld [vmem:[#allocation2 + $0x80] sm:$0xff] }
  0x1a   :  { %950 = vrcp.f32 %v412_v29  ;;  %v288_v45 = vand.u32 2147483647, %v160_v36  ;;  %v289_v46 = vand.u32 2147483647, %v161_v37  ;;  %v290_v47 = vand.u32 2147483647, %v162_v38 }
  0x1b   :  { %952 = vrcp.f32 %v413_v39  ;;  %v163_v48 = vmul.f32 0.01, %v1296_v42  ;;  %v164_v49 = vmul.f32 0.01, %v1298_v43  ;;  %v165_v50 = vmul.f32 0.01, %v1300_v44 }
  0x1c   :  { %954 = vrcp.f32 %v414_v40  ;;  %v416_v51 = vadd.f32 1.0, %v288_v45  ;;  %v417_v52 = vadd.f32 1.0, %v289_v46  ;;  %v418_v53 = vadd.f32 1.0, %v290_v47  ;;  %v1309_v56 = vld [vmem:[#allocation2 + $0x88] sm:$0xff]  ;;  %v1314_v5 = vld [vmem:[#allocation2 + $0x90] sm:$0xff]  ;;  %v1316_v9 = vld [vmem:[#allocation2 + $0x98] sm:$0xff] }
  0x1d   :  { %956 = vrcp.f32 %v415_v41  ;;  %v291_v57 = vand.u32 2147483647, %v163_v48  ;;  %v292_v58 = vand.u32 2147483647, %v164_v49  ;;  %v293_v59 = vand.u32 2147483647, %v165_v50 }
  0x1e   :  { %958 = vrcp.f32 %v416_v51  ;;  %v166_v60 = vmul.f32 0.01, %v1305_v54  ;;  %v167_v61 = vmul.f32 0.01, %v1307_v55  ;;  %v168_v62 = vmul.f32 0.01, %v1309_v56 }
  0x1f   :  { %960 = vrcp.f32 %v417_v52  ;;  %v419_v63 = vadd.f32 1.0, %v291_v57  ;;  %v420_v3 = vadd.f32 1.0, %v292_v58  ;;  %v421_v4 = vadd.f32 1.0, %v293_v59  ;;  %v1318_v10 = vld [vmem:[#allocation2 + $0xa0] sm:$0xff]  ;;  %v1323_v24 = vld [vmem:[#allocation2 + $0xa8] sm:$0xff]  ;;  %v1328_v36 = vld [vmem:[#allocation2 + $0xb0] sm:$0xff] }
  0x20   :  { %962 = vrcp.f32 %v418_v53  ;;  %v294_v11 = vand.u32 2147483647, %v166_v60  ;;  %v295_v12 = vand.u32 2147483647, %v167_v61  ;;  %v296_v13 = vand.u32 2147483647, %v168_v62 }
  0x21   :  { %964 = vrcp.f32 %v419_v63  ;;  %v169_v14 = vmul.f32 0.01, %v1314_v5  ;;  %v170_v15 = vmul.f32 0.01, %v1316_v9  ;;  %v171_v16 = vmul.f32 0.01, %v1318_v10 }
  0x22   :  { %v941_v17 = vpop.eup %940  ;;  %966 = vrcp.f32 %v420_v3  ;;  %v422_v21 = vadd.f32 1.0, %v294_v11  ;;  %v423_v22 = vadd.f32 1.0, %v295_v12  ;;  %v424_v23 = vadd.f32 1.0, %v296_v13  ;;  %v1330_v37 = vld [vmem:[#allocation2 + $0xb8] sm:$0xff]  ;;  %v1333_v41 = vld [vmem:[#allocation2 + $0xc0] sm:$0xff]  ;;  %v1339_v51 = vld [vmem:[#allocation2 + $0xc8] sm:$0xff] }
  0x23   :  { %v943_v25 = vpop.eup %942  ;;  %v536_v26 = vmul.f32 %v941_v17, %v1260_v0  ;;  %968 = vrcp.f32 %v421_v4  ;;  %v297_v27 = vand.u32 2147483647, %v169_v14  ;;  %v298_v28 = vand.u32 2147483647, %v170_v15  ;;  %v1343_v58 = vld [vmem:[#allocation2 + $0xd0] sm:$0xff]  ;;  %v1346_v62 = vld [vmem:[#allocation2 + $0xd8] sm:$0xff] }
  0x24   :  { %v945_v29 = vpop.eup %944  ;;  %v538_v33 = vmul.f32 %v943_v25, %v1262_v1  ;;  %970 = vrcp.f32 %v422_v21  ;;  %v299_v34 = vand.u32 2147483647, %v171_v16  ;;  %v172_v35 = vmul.f32 0.01, %v1323_v24  ;;  %v1350_v11 = vld [vmem:[#allocation2 + $0xe0] sm:$0xff]  ;;  %s924_s13 = sshll.u32 %s1243_s0, 4  ;;  %s925_s13 = int_to_ptr.vmem [resolvable:$true] %s924_s13 }
  0x25   :  { %v947_v38 = vpop.eup %946  ;;  %791 = vst [vmem:[#allocation5] sm:$0xff] %v536_v26  ;;  %v540_v39 = vmul.f32 %v945_v29, %v1264_v2  ;;  %972 = vrcp.f32 %v423_v22  ;;  %v425_v0 = vadd.f32 1.0, %v297_v27  ;;  %v426_v40 = vadd.f32 1.0, %v298_v28  ;;  %v1358_v27 = vld [vmem:[#allocation2 + $0xe8] sm:$0xff]  ;;  %s1216_s14 = scalar_lea.vmem %s925_s13, 16384  ;;  %p1221_p6 = scmp.lt.s32.totalorder %s925_s13, %s925_s13 }
  0x26   :  { %v949_v45 = vpop.eup %948  ;;  %792 = vst [vmem:[#allocation5 + $0x8] sm:$0xff] %v538_v33  ;;  %v542_v1 = vmul.f32 %v947_v38, %v1269_v6  ;;  %974 = vrcp.f32 %v424_v23  ;;  %v427_v46 = vadd.f32 1.0, %v299_v34  ;;  %v300_v47 = vand.u32 2147483647, %v172_v35  ;;  %v1361_v34 = vld [vmem:[#allocation2 + $0xf0] sm:$0xff]  ;;  %p1217_p5 = scmp.ne.s32.totalorder %s925_s13, %s1216_s14  ;;  %p1222_p7 = scmp.lt.s32.totalorder %s1216_s14, %s1216_s14 }
  0x27   :  { %v951_v48 = vpop.eup %950  ;;  %793 = vst [vmem:[#allocation5 + $0x10] sm:$0xff] %v540_v39  ;;  %v544_v49 = vmul.f32 %v949_v45, %v1271_v7  ;;  %976 = vrcp.f32 %v425_v0  ;;  %v173_v50 = vmul.f32 0.01, %v1328_v36  ;;  %v174_v2 = vmul.f32 0.01, %v1330_v37  ;;  %v1364_v0 = vld [vmem:[#allocation2 + $0xf8] sm:$0xff] }
  0x28   :  { %v953_v52 = vpop.eup %952  ;;  %794 = vst [vmem:[#allocation5 + $0x18] sm:$0xff] %v542_v1  ;;  %v546_v53 = vmul.f32 %v951_v48, %v1273_v8  ;;  %978 = vrcp.f32 %v426_v40  ;;  %v428_v6 = vadd.f32 1.0, %v300_v47  ;;  %v175_v57 = vmul.f32 0.01, %v1333_v41  ;;  %p1223_p8 = por %p1222_p7, %p1221_p6 }
  0x29   :  { %v955_v59 = vpop.eup %954  ;;  %795 = vst [vmem:[#allocation5 + $0x20] sm:$0xff] %v544_v49  ;;  %v548_v7 = vmul.f32 %v953_v52, %v1278_v18  ;;  %980 = vrcp.f32 %v427_v46  ;;  %v301_v60 = vand.u32 2147483647, %v173_v50  ;;  %v302_v61 = vand.u32 2147483647, %v174_v2  ;;  %v1368_v46 = vld [vmem:[#allocation2 + $0x100] sm:$0xff] }
  0x2a   :  { %v957_v63 = vpop.eup %956  ;;  %796 = vst [vmem:[#allocation5 + $0x28] sm:$0xff] %v546_v53  ;;  %v550_v3 = vmul.f32 %v955_v59, %v1280_v19  ;;  %982 = vrcp.f32 %v428_v6  ;;  %v303_v8 = vand.u32 2147483647, %v175_v57  ;;  %v176_v4 = vmul.f32 0.01, %v1339_v51  ;;  %v1372_v50 = vld [vmem:[#allocation2 + $0x108] sm:$0xff]  ;;  %p1224_p9 = pnand %p1223_p8, %p1217_p5 }
  0x2b   :  { %v959_v12 = vpop.eup %958  ;;  %797 = vst [vmem:[#allocation5 + $0x30] sm:$0xff] %v548_v7  ;;  %v552_v13 = vmul.f32 %v957_v63, %v1282_v20  ;;  %v429_v18 = vadd.f32 1.0, %v301_v60  ;;  %v430_v14 = vadd.f32 1.0, %v302_v61  ;;  %v177_v15 = vmul.f32 0.01, %v1343_v58  ;;  %v1376_v6 = vld [vmem:[#allocation2 + $0x110] sm:$0xff] }
  0x2c   :  { %v961_v16 = vpop.eup %960  ;;  %798 = vst [vmem:[#allocation5 + $0x38] sm:$0xff] %v550_v3  ;;  %v554_v17 = vmul.f32 %v959_v12, %v1287_v30  ;;  %v431_v21 = vadd.f32 1.0, %v303_v8  ;;  %v304_v19 = vand.u32 2147483647, %v176_v4  ;;  %v178_v22 = vmul.f32 0.01, %v1346_v62 }
  0x2d   :  { %v963_v23 = vpop.eup %962  ;;  %799 = vst [vmem:[#allocation5 + $0x40] sm:$0xff] %v552_v13  ;;  %v556_v25 = vmul.f32 %v961_v16, %v1289_v31  ;;  %984 = vrcp.f32 %v429_v18  ;;  %v305_v26 = vand.u32 2147483647, %v177_v15  ;;  %v179_v20 = vmul.f32 0.01, %v1350_v11  ;;  %v1384_v18 = vld [vmem:[#allocation2 + $0x118] sm:$0xff] }
  0x2e   :  { %v965_v28 = vpop.eup %964  ;;  %800 = vst [vmem:[#allocation5 + $0x48] sm:$0xff] %v554_v17  ;;  %v558_v29 = vmul.f32 %v963_v23, %v1291_v32  ;;  %986 = vrcp.f32 %v430_v14  ;;  %v432_v30 = vadd.f32 1.0, %v304_v19  ;;  %v306_v33 = vand.u32 2147483647, %v178_v22  ;;  %v1387_v17 = vld [vmem:[#allocation2 + $0x120] sm:$0xff] }
  0x2f   :  { %v967_v35 = vpop.eup %966  ;;  %801 = vst [vmem:[#allocation5 + $0x50] sm:$0xff] %v556_v25  ;;  %v560_v38 = vmul.f32 %v965_v28, %v1296_v42  ;;  %988 = vrcp.f32 %v431_v21  ;;  %v433_v31 = vadd.f32 1.0, %v305_v26  ;;  %v307_v39 = vand.u32 2147483647, %v179_v20  ;;  %v1389_v21 = vld [vmem:[#allocation2 + $0x128] sm:$0xff]  ;;  %v1392_v25 = vld [vmem:[#allocation2 + $0x130] sm:$0xff] }
  0x30   :  { %v969_v40 = vpop.eup %968  ;;  %802 = vst [vmem:[#allocation5 + $0x58] sm:$0xff] %v558_v29  ;;  %v562_v45 = vmul.f32 %v967_v35, %v1298_v43  ;;  %990 = vrcp.f32 %v432_v30  ;;  %v434_v32 = vadd.f32 1.0, %v306_v33  ;;  %v180_v1 = vmul.f32 0.01, %v1358_v27  ;;  %v1394_v26 = vld [vmem:[#allocation2 + $0x138] sm:$0xff]  ;;  %v1400_v33 = vld [vmem:[#allocation2 + $0x140] sm:$0xff] }
  0x31   :  { %v971_v47 = vpop.eup %970  ;;  %803 = vst [vmem:[#allocation5 + $0x60] sm:$0xff] %v560_v38  ;;  %v564_v48 = vmul.f32 %v969_v40, %v1300_v44  ;;  %992 = vrcp.f32 %v433_v31  ;;  %v435_v42 = vadd.f32 1.0, %v307_v39  ;;  %v181_v49 = vmul.f32 0.01, %v1361_v34 }
  0x32   :  { %v973_v2 = vpop.eup %972  ;;  %804 = vst [vmem:[#allocation5 + $0x68] sm:$0xff] %v562_v45  ;;  %v566_v43 = vmul.f32 %v971_v47, %v1305_v54  ;;  %994 = vrcp.f32 %v434_v32  ;;  %v308_v52 = vand.u32 2147483647, %v180_v1  ;;  %v182_v53 = vmul.f32 0.01, %v1364_v0 }
  0x33   :  { %v975_v57 = vpop.eup %974  ;;  %805 = vst [vmem:[#allocation5 + $0x70] sm:$0xff] %v564_v48  ;;  %v568_v44 = vmul.f32 %v973_v2, %v1307_v55  ;;  %996 = vrcp.f32 %v435_v42  ;;  %v309_v59 = vand.u32 2147483647, %v181_v49  ;;  %v183_v7 = vmul.f32 0.01, %v1368_v46  ;;  %v1406_v2 = vld [vmem:[#allocation2 + $0x148] sm:$0xff] }
  0x34   :  { %v977_v60 = vpop.eup %976  ;;  %806 = vst [vmem:[#allocation5 + $0x78] sm:$0xff] %v566_v43  ;;  %v570_v61 = vmul.f32 %v975_v57, %v1309_v56  ;;  %v436_v63 = vadd.f32 1.0, %v308_v52  ;;  %v310_v54 = vand.u32 2147483647, %v182_v53  ;;  %v184_v3 = vmul.f32 0.01, %v1372_v50 }
  0x35   :  { %v979_v8 = vpop.eup %978  ;;  %807 = vst [vmem:[#allocation5 + $0x80] sm:$0xff] %v568_v44  ;;  %v572_v4 = vmul.f32 %v977_v60, %v1314_v5  ;;  %v437_v12 = vadd.f32 1.0, %v309_v59  ;;  %v311_v13 = vand.u32 2147483647, %v183_v7  ;;  %v185_v55 = vmul.f32 0.01, %v1376_v6 }
  0x36   :  { %v981_v14 = vpop.eup %980  ;;  %808 = vst [vmem:[#allocation5 + $0x88] sm:$0xff] %v570_v61  ;;  %v574_v15 = vmul.f32 %v979_v8, %v1316_v9  ;;  %998 = vrcp.f32 %v436_v63  ;;  %v438_v56 = vadd.f32 1.0, %v310_v54  ;;  %v312_v16 = vand.u32 2147483647, %v184_v3  ;;  %v1412_v59 = vld [vmem:[#allocation2 + $0x158] sm:$0xff]  ;;  %v1417_v8 = vld [vmem:[#allocation2 + $0x160] sm:$0xff] }
  0x37   :  { %v983_v19 = vpop.eup %982  ;;  %809 = vst [vmem:[#allocation5 + $0x90] sm:$0xff] %v572_v4  ;;  %v576_v5 = vmul.f32 %v981_v14, %v1318_v10  ;;  %1000 = vrcp.f32 %v437_v12  ;;  %v439_v22 = vadd.f32 1.0, %v311_v13  ;;  %v313_v23 = vand.u32 2147483647, %v185_v55  ;;  %v1422_v55 = vld [vmem:[#allocation2 + $0x168] sm:$0xff]  ;;  %v1424_v14 = vld [vmem:[#allocation2 + $0x170] sm:$0xff] }
  0x38   :  { %810 = vst [vmem:[#allocation5 + $0x98] sm:$0xff] %v574_v15  ;;  %v578_v9 = vmul.f32 %v983_v19, %v1323_v24  ;;  %1002 = vrcp.f32 %v438_v56  ;;  %v440_v20 = vadd.f32 1.0, %v312_v16  ;;  %v186_v28 = vmul.f32 0.01, %v1384_v18 }
  0x39   :  { %811 = vst [vmem:[#allocation5 + $0xa0] sm:$0xff] %v576_v5  ;;  %1004 = vrcp.f32 %v439_v22  ;;  %v441_v29 = vadd.f32 1.0, %v313_v23  ;;  %v187_v30 = vmul.f32 0.01, %v1387_v17  ;;  %v188_v10 = vmul.f32 0.01, %v1389_v21 }
  0x3a   :  { %v985_v35 = vpop.eup %984  ;;  %812 = vst [vmem:[#allocation5 + $0xa8] sm:$0xff] %v578_v9  ;;  %1006 = vrcp.f32 %v440_v20  ;;  %v314_v38 = vand.u32 2147483647, %v186_v28  ;;  %v189_v31 = vmul.f32 0.01, %v1392_v25  ;;  %v1430_v20 = vld [vmem:[#allocation2 + $0x178] sm:$0xff] }
  0x3b   :  { %v190_v24 = vmul.f32 0.01, %v1394_v26  ;;  %v987_v39 = vpop.eup %986  ;;  %v580_v40 = vmul.f32 %v985_v35, %v1328_v36  ;;  %1008 = vrcp.f32 %v441_v29  ;;  %v315_v45 = vand.u32 2147483647, %v187_v30  ;;  %v1410_v36 = vld [vmem:[#allocation2 + $0x150] sm:$0xff] }
  0x3c   :  { %v316_v32 = vand.u32 2147483647, %v188_v10  ;;  %v989_v1 = vpop.eup %988  ;;  %v582_v47 = vmul.f32 %v987_v39, %v1330_v37  ;;  %v442_v48 = vadd.f32 1.0, %v314_v38  ;;  %v317_v42 = vand.u32 2147483647, %v189_v31  ;;  %v1434_v39 = vld [vmem:[#allocation2 + $0x180] sm:$0xff] }
  0x3d   :  { %v318_v49 = vand.u32 2147483647, %v190_v24  ;;  %v991_v43 = vpop.eup %990  ;;  %813 = vst [vmem:[#allocation5 + $0xb0] sm:$0xff] %v580_v40  ;;  %v584_v52 = vmul.f32 %v989_v1, %v1333_v41  ;;  %v443_v53 = vadd.f32 1.0, %v315_v45  ;;  %v191_v44 = vmul.f32 0.01, %v1400_v33 }
  0x3e   :  { %v444_v57 = vadd.f32 1.0, %v316_v32  ;;  %v993_v7 = vpop.eup %992  ;;  %814 = vst [vmem:[#allocation5 + $0xb8] sm:$0xff] %v582_v47  ;;  %v586_v37 = vmul.f32 %v991_v43, %v1339_v51  ;;  %1010 = vrcp.f32 %v442_v48  ;;  %v445_v60 = vadd.f32 1.0, %v317_v42  ;;  %v1440_v47 = vld [vmem:[#allocation2 + $0x190] sm:$0xff]  ;;  %v1443_v43 = vld [vmem:[#allocation2 + $0x198] sm:$0xff] }
  0x3f   :  { %v446_v61 = vadd.f32 1.0, %v318_v49  ;;  %v995_v63 = vpop.eup %994  ;;  %815 = vst [vmem:[#allocation5 + $0xc0] sm:$0xff] %v584_v52  ;;  %v588_v54 = vmul.f32 %v993_v7, %v1343_v58  ;;  %1012 = vrcp.f32 %v443_v53  ;;  %v319_v41 = vand.u32 2147483647, %v191_v44  ;;  %v1447_v44 = vld [vmem:[#allocation2 + $0x1a0] sm:$0xff] }
  0x40   :  { %v192_v3 = vmul.f32 0.01, %v1406_v2  ;;  %v997_v4 = vpop.eup %996  ;;  %816 = vst [vmem:[#allocation5 + $0xc8] sm:$0xff] %v586_v37  ;;  %v590_v12 = vmul.f32 %v995_v63, %v1346_v62  ;;  %1014 = vrcp.f32 %v444_v57  ;;  %v193_v51 = vmul.f32 0.01, %v1410_v36  ;;  %v1453_v63 = vld [vmem:[#allocation2 + $0x1a8] sm:$0xff] }
  0x41   :  { %v194_v13 = vmul.f32 0.01, %v1412_v59  ;;  %817 = vst [vmem:[#allocation5 + $0xd0] sm:$0xff] %v588_v54  ;;  %v592_v58 = vmul.f32 %v997_v4, %v1350_v11  ;;  %1016 = vrcp.f32 %v445_v60  ;;  %v447_v15 = vadd.f32 1.0, %v319_v41 }
  0x42   :  { %v320_v56 = vand.u32 2147483647, %v192_v3  ;;  %818 = vst [vmem:[#allocation5 + $0xd8] sm:$0xff] %v590_v12  ;;  %1018 = vrcp.f32 %v446_v61  ;;  %v321_v16 = vand.u32 2147483647, %v193_v51 }
  0x43   :  { %v322_v19 = vand.u32 2147483647, %v194_v13  ;;  %v195_v62 = vmul.f32 0.01, %v1417_v8  ;;  %v999_v5 = vpop.eup %998  ;;  %819 = vst [vmem:[#allocation5 + $0xe0] sm:$0xff] %v592_v58  ;;  %1020 = vrcp.f32 %v447_v15  ;;  %v1457_v58 = vld [vmem:[#allocation2 + $0x1b0] sm:$0xff] }
  0x44   :  { %v448_v22 = vadd.f32 1.0, %v320_v56  ;;  %v196_v23 = vmul.f32 0.01, %v1422_v55  ;;  %v197_v9 = vmul.f32 0.01, %v1424_v14  ;;  %v1001_v11 = vpop.eup %1000  ;;  %v594_v28 = vmul.f32 %v999_v5, %v1358_v27  ;;  %v1438_v27 = vld [vmem:[#allocation2 + $0x188] sm:$0xff] }
  0x45   :  { %v449_v29 = vadd.f32 1.0, %v321_v16  ;;  %v450_v30 = vadd.f32 1.0, %v322_v19  ;;  %v323_v10 = vand.u32 2147483647, %v195_v62  ;;  %v1003_v35 = vpop.eup %1002  ;;  %v596_v38 = vmul.f32 %v1001_v11, %v1361_v34  ;;  %v1460_v5 = vld [vmem:[#allocation2 + $0x1b8] sm:$0xff]  ;;  %v1464_v11 = vld [vmem:[#allocation2 + $0x1c0] sm:$0xff] }
  0x46   :  { %1022 = vrcp.f32 %v448_v22  ;;  %v324_v31 = vand.u32 2147483647, %v196_v23  ;;  %v325_v24 = vand.u32 2147483647, %v197_v9  ;;  %v1005_v40 = vpop.eup %1004  ;;  %820 = vst [vmem:[#allocation5 + $0xe8] sm:$0xff] %v594_v28  ;;  %v598_v45 = vmul.f32 %v1003_v35, %v1364_v0 }
  0x47   :  { %1024 = vrcp.f32 %v449_v29  ;;  %v451_v32 = vadd.f32 1.0, %v323_v10  ;;  %v198_v1 = vmul.f32 0.01, %v1430_v20  ;;  %v1007_v48 = vpop.eup %1006  ;;  %821 = vst [vmem:[#allocation5 + $0xf0] sm:$0xff] %v596_v38  ;;  %v600_v34 = vmul.f32 %v1005_v40, %v1368_v46  ;;  %v1468_v10 = vld [vmem:[#allocation2 + $0x1c8] sm:$0xff] }
  0x48   :  { %1026 = vrcp.f32 %v450_v30  ;;  %v452_v42 = vadd.f32 1.0, %v324_v31  ;;  %v453_v49 = vadd.f32 1.0, %v325_v24  ;;  %v1009_v52 = vpop.eup %1008  ;;  %822 = vst [vmem:[#allocation5 + $0xf8] sm:$0xff] %v598_v45  ;;  %v602_v0 = vmul.f32 %v1007_v48, %v1372_v50  ;;  %v1472_v24 = vld [vmem:[#allocation2 + $0x1d0] sm:$0xff] }
  0x49   :  { %1028 = vrcp.f32 %v451_v32  ;;  %v326_v53 = vand.u32 2147483647, %v198_v1  ;;  %v199_v57 = vmul.f32 0.01, %v1434_v39  ;;  %823 = vst [vmem:[#allocation5 + $0x100] sm:$0xff] %v600_v34  ;;  %v604_v7 = vmul.f32 %v1009_v52, %v1376_v6 }
  0x4a   :  { %1030 = vrcp.f32 %v452_v42  ;;  %v200_v46 = vmul.f32 0.01, %v1438_v27  ;;  %v201_v37 = vmul.f32 0.01, %v1440_v47  ;;  %824 = vst [vmem:[#allocation5 + $0x108] sm:$0xff] %v602_v0 }
  0x4b   :  { %1032 = vrcp.f32 %v453_v49  ;;  %v454_v60 = vadd.f32 1.0, %v326_v53  ;;  %v327_v61 = vand.u32 2147483647, %v199_v57  ;;  %v202_v50 = vmul.f32 0.01, %v1443_v43  ;;  %v1011_v54 = vpop.eup %1010  ;;  %825 = vst [vmem:[#allocation5 + $0x110] sm:$0xff] %v604_v7 }
  0x4c   :  { %v328_v41 = vand.u32 2147483647, %v200_v46  ;;  %v329_v3 = vand.u32 2147483647, %v201_v37  ;;  %v203_v4 = vmul.f32 0.01, %v1447_v44  ;;  %v1013_v6 = vpop.eup %1012  ;;  %v606_v12 = vmul.f32 %v1011_v54, %v1384_v18 }
  0x4d   :  { %1034 = vrcp.f32 %v454_v60  ;;  %v455_v51 = vadd.f32 1.0, %v327_v61  ;;  %v330_v13 = vand.u32 2147483647, %v202_v50  ;;  %v1015_v15 = vpop.eup %1014  ;;  %v608_v56 = vmul.f32 %v1013_v6, %v1387_v17  ;;  %v1482_v37 = vld [vmem:[#allocation2 + $0x1e0] sm:$0xff]  ;;  %v1485_v54 = vld [vmem:[#allocation2 + $0x1e8] sm:$0xff]  ;;  %v1489_v6 = vld [vmem:[#allocation2 + $0x1f0] sm:$0xff] }
  0x4e   :  { %v456_v16 = vadd.f32 1.0, %v328_v41  ;;  %v457_v19 = vadd.f32 1.0, %v329_v3  ;;  %v331_v62 = vand.u32 2147483647, %v203_v4  ;;  %v1017_v22 = vpop.eup %1016  ;;  %826 = vst [vmem:[#allocation5 + $0x118] sm:$0xff] %v606_v12  ;;  %v610_v23 = vmul.f32 %v1015_v15, %v1389_v21  ;;  %v1491_v12 = vld [vmem:[#allocation2 + $0x1f8] sm:$0xff] }
  0x4f   :  { %1036 = vrcp.f32 %v455_v51  ;;  %v458_v9 = vadd.f32 1.0, %v330_v13  ;;  %v204_v18 = vmul.f32 0.01, %v1453_v63  ;;  %v1019_v28 = vpop.eup %1018  ;;  %827 = vst [vmem:[#allocation5 + $0x120] sm:$0xff] %v608_v56  ;;  %v612_v29 = vmul.f32 %v1017_v22, %v1392_v25  ;;  %v1495_v56 = vld [vmem:[#allocation2 + $0x200] sm:$0xff] }
  0x50   :  { %1038 = vrcp.f32 %v456_v16  ;;  %v459_v17 = vadd.f32 1.0, %v331_v62  ;;  %v205_v30 = vmul.f32 0.01, %v1457_v58  ;;  %v1021_v35 = vpop.eup %1020  ;;  %828 = vst [vmem:[#allocation5 + $0x128] sm:$0xff] %v610_v23  ;;  %v614_v21 = vmul.f32 %v1019_v28, %v1394_v26 }
  0x51   :  { %1040 = vrcp.f32 %v457_v19  ;;  %v332_v38 = vand.u32 2147483647, %v204_v18  ;;  %v206_v31 = vmul.f32 0.01, %v1460_v5  ;;  %829 = vst [vmem:[#allocation5 + $0x130] sm:$0xff] %v612_v29  ;;  %v616_v40 = vmul.f32 %v1021_v35, %v1400_v33  ;;  %v1479_v33 = vld [vmem:[#allocation2 + $0x1d8] sm:$0xff] }
  0x52   :  { %1042 = vrcp.f32 %v458_v9  ;;  %v333_v25 = vand.u32 2147483647, %v205_v30  ;;  %v207_v45 = vmul.f32 0.01, %v1464_v11  ;;  %830 = vst [vmem:[#allocation5 + $0x138] sm:$0xff] %v614_v21  ;;  %v1503_v21 = vld [vmem:[#allocation2 + $0x208] sm:$0xff] }
  0x53   :  { %v1023_v32 = vpop.eup %1022  ;;  %1044 = vrcp.f32 %v459_v17  ;;  %v460_v1 = vadd.f32 1.0, %v332_v38  ;;  %v334_v48 = vand.u32 2147483647, %v206_v31  ;;  %v208_v26 = vmul.f32 0.01, %v1468_v10  ;;  %831 = vst [vmem:[#allocation5 + $0x140] sm:$0xff] %v616_v40 }
  0x54   :  { %v1025_v34 = vpop.eup %1024  ;;  %v618_v42 = vmul.f32 %v1023_v32, %v1406_v2  ;;  %v461_v49 = vadd.f32 1.0, %v333_v25  ;;  %v335_v52 = vand.u32 2147483647, %v207_v45  ;;  %v209_v0 = vmul.f32 0.01, %v1472_v24  ;;  %v1506_v45 = vld [vmem:[#allocation2 + $0x210] sm:$0xff] }
  0x55   :  { %v1027_v53 = vpop.eup %1026  ;;  %v620_v57 = vmul.f32 %v1025_v34, %v1410_v36  ;;  %1046 = vrcp.f32 %v460_v1  ;;  %v462_v7 = vadd.f32 1.0, %v334_v48  ;;  %v336_v46 = vand.u32 2147483647, %v208_v26  ;;  %v1511_v34 = vld [vmem:[#allocation2 + $0x220] sm:$0xff] }
  0x56   :  { %v1029_v60 = vpop.eup %1028  ;;  %832 = vst [vmem:[#allocation5 + $0x148] sm:$0xff] %v618_v42  ;;  %v622_v61 = vmul.f32 %v1027_v53, %v1412_v59  ;;  %1048 = vrcp.f32 %v461_v49  ;;  %v463_v2 = vadd.f32 1.0, %v335_v52  ;;  %v337_v50 = vand.u32 2147483647, %v209_v0  ;;  %v1515_v0 = vld [vmem:[#allocation2 + $0x228] sm:$0xff] }
  0x57   :  { %v1031_v41 = vpop.eup %1030  ;;  %833 = vst [vmem:[#allocation5 + $0x150] sm:$0xff] %v620_v57  ;;  %v624_v3 = vmul.f32 %v1029_v60, %v1417_v8  ;;  %1050 = vrcp.f32 %v462_v7  ;;  %v464_v36 = vadd.f32 1.0, %v336_v46  ;;  %v210_v4 = vmul.f32 0.01, %v1479_v33  ;;  %v1520_v46 = vld [vmem:[#allocation2 + $0x230] sm:$0xff] }
  0x58   :  { %v1033_v51 = vpop.eup %1032  ;;  %834 = vst [vmem:[#allocation5 + $0x158] sm:$0xff] %v622_v61  ;;  %v626_v59 = vmul.f32 %v1031_v41, %v1422_v55  ;;  %1052 = vrcp.f32 %v463_v2  ;;  %v465_v13 = vadd.f32 1.0, %v337_v50  ;;  %v211_v15 = vmul.f32 0.01, %v1482_v37 }
  0x59   :  { %835 = vst [vmem:[#allocation5 + $0x160] sm:$0xff] %v624_v3  ;;  %v628_v8 = vmul.f32 %v1033_v51, %v1424_v14  ;;  %1054 = vrcp.f32 %v464_v36  ;;  %v338_v16 = vand.u32 2147483647, %v210_v4  ;;  %v212_v19 = vmul.f32 0.01, %v1485_v54 }
  0x5a   :  { %v1035_v62 = vpop.eup %1034  ;;  %836 = vst [vmem:[#allocation5 + $0x168] sm:$0xff] %v626_v59  ;;  %1056 = vrcp.f32 %v465_v13  ;;  %v339_v22 = vand.u32 2147483647, %v211_v15  ;;  %v213_v23 = vmul.f32 0.01, %v1489_v6 }
  0x5b   :  { %v214_v55 = vmul.f32 0.01, %v1491_v12  ;;  %837 = vst [vmem:[#allocation5 + $0x170] sm:$0xff] %v628_v8  ;;  %v630_v9 = vmul.f32 %v1035_v62, %v1430_v20  ;;  %v466_v18 = vadd.f32 1.0, %v338_v16  ;;  %v340_v28 = vand.u32 2147483647, %v212_v19 }
  0x5c   :  { %v215_v29 = vmul.f32 0.01, %v1495_v56  ;;  %v1037_v14 = vpop.eup %1036  ;;  %v467_v17 = vadd.f32 1.0, %v339_v22  ;;  %v341_v30 = vand.u32 2147483647, %v213_v23  ;;  %v1508_v20 = vld [vmem:[#allocation2 + $0x218] sm:$0xff] }
  0x5d   :  { %v342_v35 = vand.u32 2147483647, %v214_v55  ;;  %v1039_v38 = vpop.eup %1038  ;;  %838 = vst [vmem:[#allocation5 + $0x178] sm:$0xff] %v630_v9  ;;  %v632_v31 = vmul.f32 %v1037_v14, %v1434_v39  ;;  %1058 = vrcp.f32 %v466_v18  ;;  %v468_v40 = vadd.f32 1.0, %v340_v28  ;;  %v1530_v62 = vld [vmem:[#allocation2 + $0x240] sm:$0xff]  ;;  %v1533_v9 = vld [vmem:[#allocation2 + $0x248] sm:$0xff] }
  0x5e   :  { %v343_v25 = vand.u32 2147483647, %v215_v29  ;;  %v1041_v32 = vpop.eup %1040  ;;  %v634_v1 = vmul.f32 %v1039_v38, %v1438_v27  ;;  %1060 = vrcp.f32 %v467_v17  ;;  %v469_v48 = vadd.f32 1.0, %v341_v30  ;;  %v1537_v14 = vld [vmem:[#allocation2 + $0x250] sm:$0xff]  ;;  %v1539_v17 = vld [vmem:[#allocation2 + $0x258] sm:$0xff] }
  0x5f   :  { %v470_v26 = vadd.f32 1.0, %v342_v35  ;;  %v1043_v42 = vpop.eup %1042  ;;  %839 = vst [vmem:[#allocation5 + $0x180] sm:$0xff] %v632_v31  ;;  %v636_v49 = vmul.f32 %v1041_v32, %v1440_v47  ;;  %1062 = vrcp.f32 %v468_v40  ;;  %v216_v52 = vmul.f32 0.01, %v1503_v21  ;;  %v1543_v31 = vld [vmem:[#allocation2 + $0x260] sm:$0xff] }
  0x60   :  { %v471_v39 = vadd.f32 1.0, %v343_v25  ;;  %v1045_v53 = vpop.eup %1044  ;;  %840 = vst [vmem:[#allocation5 + $0x188] sm:$0xff] %v634_v1  ;;  %v638_v57 = vmul.f32 %v1043_v42, %v1443_v43  ;;  %1064 = vrcp.f32 %v469_v48  ;;  %v217_v27 = vmul.f32 0.01, %v1506_v45 }
  0x61   :  { %v218_v7 = vmul.f32 0.01, %v1508_v20  ;;  %841 = vst [vmem:[#allocation5 + $0x190] sm:$0xff] %v636_v49  ;;  %v640_v47 = vmul.f32 %v1045_v53, %v1447_v44  ;;  %1066 = vrcp.f32 %v470_v26  ;;  %v344_v60 = vand.u32 2147483647, %v216_v52  ;;  %v1527_v44 = vld [vmem:[#allocation2 + $0x238] sm:$0xff] }
  0x62   :  { %v219_v61 = vmul.f32 0.01, %v1511_v34  ;;  %v1047_v2 = vpop.eup %1046  ;;  %842 = vst [vmem:[#allocation5 + $0x198] sm:$0xff] %v638_v57  ;;  %1068 = vrcp.f32 %v471_v39  ;;  %v345_v50 = vand.u32 2147483647, %v217_v27  ;;  %v1551_v27 = vld [vmem:[#allocation2 + $0x268] sm:$0xff] }
  0x63   :  { %v346_v41 = vand.u32 2147483647, %v218_v7  ;;  %v220_v43 = vmul.f32 0.01, %v1515_v0  ;;  %v1049_v3 = vpop.eup %1048  ;;  %843 = vst [vmem:[#allocation5 + $0x1a0] sm:$0xff] %v640_v47  ;;  %v642_v36 = vmul.f32 %v1047_v2, %v1453_v63  ;;  %v472_v4 = vadd.f32 1.0, %v344_v60 }
  0x64   :  { %v347_v51 = vand.u32 2147483647, %v219_v61  ;;  %v221_v59 = vmul.f32 0.01, %v1520_v46  ;;  %v1051_v13 = vpop.eup %1050  ;;  %v644_v15 = vmul.f32 %v1049_v3, %v1457_v58  ;;  %v473_v8 = vadd.f32 1.0, %v345_v50  ;;  %v1554_v2 = vld [vmem:[#allocation2 + $0x270] sm:$0xff] }
  0x65   :  { %v474_v16 = vadd.f32 1.0, %v346_v41  ;;  %v348_v19 = vand.u32 2147483647, %v220_v43  ;;  %v1053_v22 = vpop.eup %1052  ;;  %844 = vst [vmem:[#allocation5 + $0x1a8] sm:$0xff] %v642_v36  ;;  %v646_v23 = vmul.f32 %v1051_v13, %v1460_v5  ;;  %1070 = vrcp.f32 %v472_v4  ;;  %v1556_v50 = vld [vmem:[#allocation2 + $0x278] sm:$0xff]  ;;  %v1559_v36 = vld [vmem:[#allocation2 + $0x280] sm:$0xff] }
  0x66   :  { %v475_v63 = vadd.f32 1.0, %v347_v51  ;;  %v349_v55 = vand.u32 2147483647, %v221_v59  ;;  %v1055_v18 = vpop.eup %1054  ;;  %845 = vst [vmem:[#allocation5 + $0x1b0] sm:$0xff] %v644_v15  ;;  %v648_v28 = vmul.f32 %v1053_v22, %v1464_v11  ;;  %1072 = vrcp.f32 %v473_v8  ;;  %v1563_v13 = vld [vmem:[#allocation2 + $0x288] sm:$0xff] }
  0x67   :  { %v476_v58 = vadd.f32 1.0, %v348_v19  ;;  %v222_v29 = vmul.f32 0.01, %v1527_v44  ;;  %v1057_v30 = vpop.eup %1056  ;;  %846 = vst [vmem:[#allocation5 + $0x1b8] sm:$0xff] %v646_v23  ;;  %v650_v5 = vmul.f32 %v1055_v18, %v1468_v10  ;;  %1074 = vrcp.f32 %v474_v16  ;;  %v1568_v19 = vld [vmem:[#allocation2 + $0x290] sm:$0xff] }
  0x68   :  { %v477_v35 = vadd.f32 1.0, %v349_v55  ;;  %v223_v38 = vmul.f32 0.01, %v1530_v62  ;;  %847 = vst [vmem:[#allocation5 + $0x1c0] sm:$0xff] %v648_v28  ;;  %v652_v11 = vmul.f32 %v1057_v30, %v1472_v24  ;;  %1076 = vrcp.f32 %v475_v63  ;;  %v1574_v30 = vld [vmem:[#allocation2 + $0x298] sm:$0xff] }
  0x69   :  { %v350_v40 = vand.u32 2147483647, %v222_v29  ;;  %v224_v25 = vmul.f32 0.01, %v1533_v9  ;;  %848 = vst [vmem:[#allocation5 + $0x1c8] sm:$0xff] %v650_v5  ;;  %1078 = vrcp.f32 %v476_v58 }
  0x6a   :  { %v351_v32 = vand.u32 2147483647, %v223_v38  ;;  %v225_v1 = vmul.f32 0.01, %v1537_v14  ;;  %v226_v10 = vmul.f32 0.01, %v1539_v17  ;;  %v1059_v48 = vpop.eup %1058  ;;  %1080 = vrcp.f32 %v477_v35 }
  0x6b   :  { %849 = vst [vmem:[#allocation5 + $0x1d0] sm:$0xff] %v652_v11  ;;  %v478_v26 = vadd.f32 1.0, %v350_v40  ;;  %v352_v42 = vand.u32 2147483647, %v224_v25  ;;  %v227_v49 = vmul.f32 0.01, %v1543_v31  ;;  %v1061_v39 = vpop.eup %1060  ;;  %v654_v24 = vmul.f32 %v1059_v48, %v1479_v33 }
  0x6c   :  { %v479_v52 = vadd.f32 1.0, %v351_v32  ;;  %v353_v53 = vand.u32 2147483647, %v225_v1  ;;  %v354_v57 = vand.u32 2147483647, %v226_v10  ;;  %v1063_v7 = vpop.eup %1062  ;;  %v656_v47 = vmul.f32 %v1061_v39, %v1482_v37  ;;  %v1577_v40 = vld [vmem:[#allocation2 + $0x2a0] sm:$0xff] }
  0x6d   :  { %1082 = vrcp.f32 %v478_v26  ;;  %v480_v60 = vadd.f32 1.0, %v352_v42  ;;  %v355_v61 = vand.u32 2147483647, %v227_v49  ;;  %v1065_v41 = vpop.eup %1064  ;;  %850 = vst [vmem:[#allocation5 + $0x1d8] sm:$0xff] %v654_v24  ;;  %v658_v43 = vmul.f32 %v1063_v7, %v1485_v54  ;;  %v1580_v48 = vld [vmem:[#allocation2 + $0x2a8] sm:$0xff]  ;;  %v1584_v39 = vld [vmem:[#allocation2 + $0x2b0] sm:$0xff] }
  0x6e   :  { %1084 = vrcp.f32 %v479_v52  ;;  %v481_v33 = vadd.f32 1.0, %v353_v53  ;;  %v482_v3 = vadd.f32 1.0, %v354_v57  ;;  %v1067_v4 = vpop.eup %1066  ;;  %851 = vst [vmem:[#allocation5 + $0x1e0] sm:$0xff] %v656_v47  ;;  %v660_v37 = vmul.f32 %v1065_v41, %v1489_v6  ;;  %v1588_v57 = vld [vmem:[#allocation2 + $0x2b8] sm:$0xff] }
  0x6f   :  { %1086 = vrcp.f32 %v480_v60  ;;  %v483_v51 = vadd.f32 1.0, %v355_v61  ;;  %v228_v59 = vmul.f32 0.01, %v1551_v27  ;;  %v1069_v15 = vpop.eup %1068  ;;  %852 = vst [vmem:[#allocation5 + $0x1e8] sm:$0xff] %v658_v43  ;;  %v662_v8 = vmul.f32 %v1067_v4, %v1491_v12  ;;  %v1592_v61 = vld [vmem:[#allocation2 + $0x2c0] sm:$0xff] }
  0x70   :  { %1088 = vrcp.f32 %v481_v33  ;;  %v229_v54 = vmul.f32 0.01, %v1554_v2  ;;  %v230_v16 = vmul.f32 0.01, %v1556_v50  ;;  %853 = vst [vmem:[#allocation5 + $0x1f0] sm:$0xff] %v660_v37  ;;  %v664_v6 = vmul.f32 %v1069_v15, %v1495_v56 }
  0x71   :  { %1090 = vrcp.f32 %v482_v3  ;;  %v356_v22 = vand.u32 2147483647, %v228_v59  ;;  %v231_v23 = vmul.f32 0.01, %v1559_v36  ;;  %854 = vst [vmem:[#allocation5 + $0x1f8] sm:$0xff] %v662_v8 }
  0x72   :  { %1092 = vrcp.f32 %v483_v51  ;;  %v357_v63 = vand.u32 2147483647, %v229_v54  ;;  %v358_v55 = vand.u32 2147483647, %v230_v16  ;;  %v232_v12 = vmul.f32 0.01, %v1563_v13  ;;  %v1071_v18 = vpop.eup %1070 }
  0x73   :  { %855 = vst [vmem:[#allocation5 + $0x200] sm:$0xff] %v664_v6  ;;  %v484_v28 = vadd.f32 1.0, %v356_v22  ;;  %v359_v58 = vand.u32 2147483647, %v231_v23  ;;  %v233_v29 = vmul.f32 0.01, %v1568_v19  ;;  %v1073_v5 = vpop.eup %1072  ;;  %v666_v56 = vmul.f32 %v1071_v18, %v1503_v21 }
  0x74   :  { %v485_v35 = vadd.f32 1.0, %v357_v63  ;;  %v486_v38 = vadd.f32 1.0, %v358_v55  ;;  %v360_v11 = vand.u32 2147483647, %v232_v12  ;;  %v1075_v25 = vpop.eup %1074  ;;  %v668_v32 = vmul.f32 %v1073_v5, %v1506_v45  ;;  %v1602_v23 = vld [vmem:[#allocation2 + $0x2d0] sm:$0xff]  ;;  %v1605_v18 = vld [vmem:[#allocation2 + $0x2d8] sm:$0xff] }
  0x75   :  { %1094 = vrcp.f32 %v484_v28  ;;  %v487_v1 = vadd.f32 1.0, %v359_v58  ;;  %v361_v10 = vand.u32 2147483647, %v233_v29  ;;  %v1077_v26 = vpop.eup %1076  ;;  %856 = vst [vmem:[#allocation5 + $0x208] sm:$0xff] %v666_v56  ;;  %v670_v42 = vmul.f32 %v1075_v25, %v1508_v20  ;;  %v1609_v5 = vld [vmem:[#allocation2 + $0x2e0] sm:$0xff]  ;;  %v1611_v56 = vld [vmem:[#allocation2 + $0x2e8] sm:$0xff] }
  0x76   :  { %1096 = vrcp.f32 %v485_v35  ;;  %v488_v49 = vadd.f32 1.0, %v360_v11  ;;  %v234_v21 = vmul.f32 0.01, %v1574_v30  ;;  %v1079_v24 = vpop.eup %1078  ;;  %857 = vst [vmem:[#allocation5 + $0x210] sm:$0xff] %v668_v32  ;;  %v672_v52 = vmul.f32 %v1077_v26, %v1511_v34  ;;  %v1615_v25 = vld [vmem:[#allocation2 + $0x2f0] sm:$0xff] }
  0x77   :  { %1098 = vrcp.f32 %v486_v38  ;;  %v489_v45 = vadd.f32 1.0, %v361_v10  ;;  %v235_v53 = vmul.f32 0.01, %v1577_v40  ;;  %v1081_v7 = vpop.eup %1080  ;;  %858 = vst [vmem:[#allocation5 + $0x218] sm:$0xff] %v670_v42  ;;  %v674_v20 = vmul.f32 %v1079_v24, %v1515_v0 }
  0x78   :  { %1100 = vrcp.f32 %v487_v1  ;;  %v362_v47 = vand.u32 2147483647, %v234_v21  ;;  %v236_v60 = vmul.f32 0.01, %v1580_v48  ;;  %859 = vst [vmem:[#allocation5 + $0x220] sm:$0xff] %v672_v52  ;;  %v676_v41 = vmul.f32 %v1081_v7, %v1520_v46  ;;  %v1599_v46 = vld [vmem:[#allocation2 + $0x2c8] sm:$0xff] }
  0x79   :  { %1102 = vrcp.f32 %v488_v49  ;;  %v363_v34 = vand.u32 2147483647, %v235_v53  ;;  %v237_v43 = vmul.f32 0.01, %v1584_v39  ;;  %860 = vst [vmem:[#allocation5 + $0x228] sm:$0xff] %v674_v20  ;;  %v1623_v20 = vld [vmem:[#allocation2 + $0x2f8] sm:$0xff] }
  0x7a   :  { %v1083_v33 = vpop.eup %1082  ;;  %1104 = vrcp.f32 %v489_v45  ;;  %v490_v3 = vadd.f32 1.0, %v362_v47  ;;  %v364_v4 = vand.u32 2147483647, %v236_v60  ;;  %v238_v0 = vmul.f32 0.01, %v1588_v57  ;;  %861 = vst [vmem:[#allocation5 + $0x230] sm:$0xff] %v676_v41 }
  0x7b   :  { %v1085_v37 = vpop.eup %1084  ;;  %v678_v51 = vmul.f32 %v1083_v33, %v1527_v44  ;;  %v491_v59 = vadd.f32 1.0, %v363_v34  ;;  %v365_v15 = vand.u32 2147483647, %v237_v43  ;;  %v239_v8 = vmul.f32 0.01, %v1592_v61  ;;  %v1626_v43 = vld [vmem:[#allocation2 + $0x300] sm:$0xff] }
  0x7c   :  { %v1087_v54 = vpop.eup %1086  ;;  %v680_v16 = vmul.f32 %v1085_v37, %v1530_v62  ;;  %1106 = vrcp.f32 %v490_v3  ;;  %v492_v6 = vadd.f32 1.0, %v364_v4  ;;  %v366_v22 = vand.u32 2147483647, %v238_v0  ;;  %v1628_v33 = vld [vmem:[#allocation2 + $0x308] sm:$0xff]  ;;  %v1631_v37 = vld [vmem:[#allocation2 + $0x310] sm:$0xff] }
  0x7d   :  { %v1089_v63 = vpop.eup %1088  ;;  %862 = vst [vmem:[#allocation5 + $0x238] sm:$0xff] %v678_v51  ;;  %v682_v55 = vmul.f32 %v1087_v54, %v1533_v9  ;;  %1108 = vrcp.f32 %v491_v59  ;;  %v493_v44 = vadd.f32 1.0, %v365_v15  ;;  %v367_v12 = vand.u32 2147483647, %v239_v8  ;;  %v1635_v8 = vld [vmem:[#allocation2 + $0x318] sm:$0xff] }
  0x7e   :  { %v1091_v28 = vpop.eup %1090  ;;  %863 = vst [vmem:[#allocation5 + $0x240] sm:$0xff] %v680_v16  ;;  %v684_v58 = vmul.f32 %v1089_v63, %v1537_v14  ;;  %1110 = vrcp.f32 %v492_v6  ;;  %v494_v62 = vadd.f32 1.0, %v366_v22  ;;  %v240_v29 = vmul.f32 0.01, %v1599_v46  ;;  %v1640_v22 = vld [vmem:[#allocation2 + $0x320] sm:$0xff] }
  0x7f   :  { %v1093_v35 = vpop.eup %1092  ;;  %864 = vst [vmem:[#allocation5 + $0x248] sm:$0xff] %v682_v55  ;;  %v686_v9 = vmul.f32 %v1091_v28, %v1539_v17  ;;  %1112 = vrcp.f32 %v493_v44  ;;  %v495_v38 = vadd.f32 1.0, %v367_v12  ;;  %v241_v11 = vmul.f32 0.01, %v1602_v23 }
  0x80   :  { %865 = vst [vmem:[#allocation5 + $0x250] sm:$0xff] %v684_v58  ;;  %v688_v14 = vmul.f32 %v1093_v35, %v1543_v31  ;;  %1114 = vrcp.f32 %v494_v62  ;;  %v368_v32 = vand.u32 2147483647, %v240_v29  ;;  %v242_v1 = vmul.f32 0.01, %v1605_v18 }
  0x81   :  { %866 = vst [vmem:[#allocation5 + $0x258] sm:$0xff] %v686_v9  ;;  %1116 = vrcp.f32 %v495_v38  ;;  %v369_v10 = vand.u32 2147483647, %v241_v11  ;;  %v243_v26 = vmul.f32 0.01, %v1609_v5 }
  0x82   :  { %v244_v17 = vmul.f32 0.01, %v1611_v56  ;;  %v1095_v42 = vpop.eup %1094  ;;  %867 = vst [vmem:[#allocation5 + $0x260] sm:$0xff] %v688_v14  ;;  %v496_v49 = vadd.f32 1.0, %v368_v32  ;;  %v370_v21 = vand.u32 2147483647, %v242_v1 }
  0x83   :  { %v245_v24 = vmul.f32 0.01, %v1615_v25  ;;  %v1097_v52 = vpop.eup %1096  ;;  %v690_v31 = vmul.f32 %v1095_v42, %v1551_v27  ;;  %v497_v45 = vadd.f32 1.0, %v369_v10  ;;  %v371_v53 = vand.u32 2147483647, %v243_v26  ;;  %v1650_v10 = vld [vmem:[#allocation2 + $0x330] sm:$0xff] }
  0x84   :  { %v372_v7 = vand.u32 2147483647, %v244_v17  ;;  %v1099_v47 = vpop.eup %1098  ;;  %v692_v60 = vmul.f32 %v1097_v52, %v1554_v2  ;;  %1118 = vrcp.f32 %v496_v49  ;;  %v498_v41 = vadd.f32 1.0, %v370_v21  ;;  %v1653_v49 = vld [vmem:[#allocation2 + $0x338] sm:$0xff] }
  0x85   :  { %v373_v34 = vand.u32 2147483647, %v245_v24  ;;  %v1101_v3 = vpop.eup %1100  ;;  %868 = vst [vmem:[#allocation5 + $0x268] sm:$0xff] %v690_v31  ;;  %v694_v4 = vmul.f32 %v1099_v47, %v1556_v50  ;;  %1120 = vrcp.f32 %v497_v45  ;;  %v499_v27 = vadd.f32 1.0, %v371_v53  ;;  %v1657_v31 = vld [vmem:[#allocation2 + $0x340] sm:$0xff]  ;;  %v1659_v45 = vld [vmem:[#allocation2 + $0x348] sm:$0xff] }
  0x86   :  { %v500_v0 = vadd.f32 1.0, %v372_v7  ;;  %v1103_v51 = vpop.eup %1102  ;;  %869 = vst [vmem:[#allocation5 + $0x270] sm:$0xff] %v692_v60  ;;  %v696_v2 = vmul.f32 %v1101_v3, %v1559_v36  ;;  %1122 = vrcp.f32 %v498_v41  ;;  %v246_v15 = vmul.f32 0.01, %v1623_v20  ;;  %v1663_v60 = vld [vmem:[#allocation2 + $0x350] sm:$0xff] }
  0x87   :  { %v501_v59 = vadd.f32 1.0, %v373_v34  ;;  %v1105_v54 = vpop.eup %1104  ;;  %870 = vst [vmem:[#allocation5 + $0x278] sm:$0xff] %v694_v4  ;;  %v698_v16 = vmul.f32 %v1103_v51, %v1563_v13  ;;  %1124 = vrcp.f32 %v499_v27  ;;  %v247_v50 = vmul.f32 0.01, %v1626_v43 }
  0x88   :  { %v248_v6 = vmul.f32 0.01, %v1628_v33  ;;  %871 = vst [vmem:[#allocation5 + $0x280] sm:$0xff] %v696_v2  ;;  %v700_v36 = vmul.f32 %v1105_v54, %v1568_v19  ;;  %1126 = vrcp.f32 %v500_v0  ;;  %v374_v63 = vand.u32 2147483647, %v246_v15  ;;  %v1647_v19 = vld [vmem:[#allocation2 + $0x328] sm:$0xff] }
  0x89   :  { %v249_v55 = vmul.f32 0.01, %v1631_v37  ;;  %v1107_v44 = vpop.eup %1106  ;;  %872 = vst [vmem:[#allocation5 + $0x288] sm:$0xff] %v698_v16  ;;  %1128 = vrcp.f32 %v501_v59  ;;  %v375_v12 = vand.u32 2147483647, %v247_v50  ;;  %v1671_v50 = vld [vmem:[#allocation2 + $0x358] sm:$0xff] }
  0x8a   :  { %v376_v28 = vand.u32 2147483647, %v248_v6  ;;  %v250_v13 = vmul.f32 0.01, %v1635_v8  ;;  %v1109_v58 = vpop.eup %1108  ;;  %873 = vst [vmem:[#allocation5 + $0x290] sm:$0xff] %v700_v36  ;;  %v702_v62 = vmul.f32 %v1107_v44, %v1574_v30  ;;  %v502_v29 = vadd.f32 1.0, %v374_v63 }
  0x8b   :  { %v377_v35 = vand.u32 2147483647, %v249_v55  ;;  %v251_v9 = vmul.f32 0.01, %v1640_v22  ;;  %v1111_v38 = vpop.eup %1110  ;;  %v704_v11 = vmul.f32 %v1109_v58, %v1577_v40  ;;  %v503_v14 = vadd.f32 1.0, %v375_v12  ;;  %v1674_v44 = vld [vmem:[#allocation2 + $0x360] sm:$0xff] }
  0x8c   :  { %v504_v32 = vadd.f32 1.0, %v376_v28  ;;  %v378_v1 = vand.u32 2147483647, %v250_v13  ;;  %v1113_v26 = vpop.eup %1112  ;;  %874 = vst [vmem:[#allocation5 + $0x298] sm:$0xff] %v702_v62  ;;  %v706_v17 = vmul.f32 %v1111_v38, %v1580_v48  ;;  %1130 = vrcp.f32 %v502_v29  ;;  %v1676_v12 = vld [vmem:[#allocation2 + $0x368] sm:$0xff]  ;;  %v1679_v62 = vld [vmem:[#allocation2 + $0x370] sm:$0xff] }
  0x8d   :  { %v505_v30 = vadd.f32 1.0, %v377_v35  ;;  %v379_v42 = vand.u32 2147483647, %v251_v9  ;;  %v1115_v21 = vpop.eup %1114  ;;  %875 = vst [vmem:[#allocation5 + $0x2a0] sm:$0xff] %v704_v11  ;;  %v708_v24 = vmul.f32 %v1113_v26, %v1584_v39  ;;  %1132 = vrcp.f32 %v503_v14  ;;  %v1683_v38 = vld [vmem:[#allocation2 + $0x378] sm:$0xff] }
  0x8e   :  { %v506_v40 = vadd.f32 1.0, %v378_v1  ;;  %v252_v52 = vmul.f32 0.01, %v1647_v19  ;;  %v1117_v53 = vpop.eup %1116  ;;  %876 = vst [vmem:[#allocation5 + $0x2a8] sm:$0xff] %v706_v17  ;;  %v710_v48 = vmul.f32 %v1115_v21, %v1588_v57  ;;  %1134 = vrcp.f32 %v504_v32  ;;  %v1688_v1 = vld [vmem:[#allocation2 + $0x380] sm:$0xff] }
  0x8f   :  { %v507_v7 = vadd.f32 1.0, %v379_v42  ;;  %v253_v47 = vmul.f32 0.01, %v1650_v10  ;;  %877 = vst [vmem:[#allocation5 + $0x2b0] sm:$0xff] %v708_v24  ;;  %v712_v39 = vmul.f32 %v1117_v53, %v1592_v61  ;;  %1136 = vrcp.f32 %v505_v30  ;;  %v1694_v53 = vld [vmem:[#allocation2 + $0x388] sm:$0xff] }
  0x90   :  { %v380_v41 = vand.u32 2147483647, %v252_v52  ;;  %v254_v34 = vmul.f32 0.01, %v1653_v49  ;;  %878 = vst [vmem:[#allocation5 + $0x2b8] sm:$0xff] %v710_v48  ;;  %1138 = vrcp.f32 %v506_v40 }
  0x91   :  { %v381_v3 = vand.u32 2147483647, %v253_v47  ;;  %v255_v4 = vmul.f32 0.01, %v1657_v31  ;;  %v256_v57 = vmul.f32 0.01, %v1659_v45  ;;  %v1119_v27 = vpop.eup %1118  ;;  %1140 = vrcp.f32 %v507_v7 }
  0x92   :  { %879 = vst [vmem:[#allocation5 + $0x2c0] sm:$0xff] %v712_v39  ;;  %v508_v0 = vadd.f32 1.0, %v380_v41  ;;  %v382_v51 = vand.u32 2147483647, %v254_v34  ;;  %v257_v2 = vmul.f32 0.01, %v1663_v60  ;;  %v1121_v59 = vpop.eup %1120  ;;  %v714_v61 = vmul.f32 %v1119_v27, %v1599_v46 }
  0x93   :  { %v509_v15 = vadd.f32 1.0, %v381_v3  ;;  %v383_v54 = vand.u32 2147483647, %v255_v4  ;;  %v384_v16 = vand.u32 2147483647, %v256_v57  ;;  %v1123_v6 = vpop.eup %1122  ;;  %v716_v36 = vmul.f32 %v1121_v59, %v1602_v23  ;;  %v1697_v41 = vld [vmem:[#allocation2 + $0x390] sm:$0xff] }
  0x94   :  { %1142 = vrcp.f32 %v508_v0  ;;  %v510_v63 = vadd.f32 1.0, %v382_v51  ;;  %v385_v55 = vand.u32 2147483647, %v257_v2  ;;  %v1125_v28 = vpop.eup %1124  ;;  %880 = vst [vmem:[#allocation5 + $0x2c8] sm:$0xff] %v714_v61  ;;  %v718_v13 = vmul.f32 %v1123_v6, %v1605_v18  ;;  %v1700_v27 = vld [vmem:[#allocation2 + $0x398] sm:$0xff]  ;;  %v1704_v59 = vld [vmem:[#allocation2 + $0x3a0] sm:$0xff] }
  0x95   :  { %1144 = vrcp.f32 %v509_v15  ;;  %v511_v46 = vadd.f32 1.0, %v383_v54  ;;  %v512_v58 = vadd.f32 1.0, %v384_v16  ;;  %v1127_v29 = vpop.eup %1126  ;;  %881 = vst [vmem:[#allocation5 + $0x2d0] sm:$0xff] %v716_v36  ;;  %v720_v23 = vmul.f32 %v1125_v28, %v1609_v5  ;;  %v1708_v16 = vld [vmem:[#allocation2 + $0x3a8] sm:$0xff] }
  0x96   :  { %1146 = vrcp.f32 %v510_v63  ;;  %v513_v35 = vadd.f32 1.0, %v385_v55  ;;  %v258_v9 = vmul.f32 0.01, %v1671_v50  ;;  %v1129_v11 = vpop.eup %1128  ;;  %882 = vst [vmem:[#allocation5 + $0x2d8] sm:$0xff] %v718_v13  ;;  %v722_v14 = vmul.f32 %v1127_v29, %v1611_v56  ;;  %v1712_v55 = vld [vmem:[#allocation2 + $0x3b0] sm:$0xff] }
  0x97   :  { %1148 = vrcp.f32 %v511_v46  ;;  %v259_v18 = vmul.f32 0.01, %v1674_v44  ;;  %v260_v32 = vmul.f32 0.01, %v1676_v12  ;;  %883 = vst [vmem:[#allocation5 + $0x2e0] sm:$0xff] %v720_v23  ;;  %v724_v5 = vmul.f32 %v1129_v11, %v1615_v25 }
  0x98   :  { %1150 = vrcp.f32 %v512_v58  ;;  %v386_v26 = vand.u32 2147483647, %v258_v9  ;;  %v261_v17 = vmul.f32 0.01, %v1679_v62  ;;  %884 = vst [vmem:[#allocation5 + $0x2e8] sm:$0xff] %v722_v14 }
  0x99   :  { %1152 = vrcp.f32 %v513_v35  ;;  %v387_v30 = vand.u32 2147483647, %v259_v18  ;;  %v388_v42 = vand.u32 2147483647, %v260_v32  ;;  %v262_v56 = vmul.f32 0.01, %v1683_v38  ;;  %v1131_v21 = vpop.eup %1130 }
  0x9a   :  { %885 = vst [vmem:[#allocation5 + $0x2f0] sm:$0xff] %v724_v5  ;;  %v514_v24 = vadd.f32 1.0, %v386_v26  ;;  %v389_v40 = vand.u32 2147483647, %v261_v17  ;;  %v263_v52 = vmul.f32 0.01, %v1688_v1  ;;  %v1133_v48 = vpop.eup %1132  ;;  %v726_v25 = vmul.f32 %v1131_v21, %v1623_v20 }
  0x9b   :  { %v515_v7 = vadd.f32 1.0, %v387_v30  ;;  %v516_v47 = vadd.f32 1.0, %v388_v42  ;;  %v390_v39 = vand.u32 2147483647, %v262_v56  ;;  %v1135_v34 = vpop.eup %1134  ;;  %v728_v3 = vmul.f32 %v1133_v48, %v1626_v43  ;;  %v1722_v17 = vld [vmem:[#allocation2 + $0x3c0] sm:$0xff]  ;;  %v1725_v21 = vld [vmem:[#allocation2 + $0x3c8] sm:$0xff] }
  0x9c   :  { %1154 = vrcp.f32 %v514_v24  ;;  %v517_v4 = vadd.f32 1.0, %v389_v40  ;;  %v391_v57 = vand.u32 2147483647, %v263_v52  ;;  %v1137_v0 = vpop.eup %1136  ;;  %886 = vst [vmem:[#allocation5 + $0x2f8] sm:$0xff] %v726_v25  ;;  %v730_v51 = vmul.f32 %v1135_v34, %v1628_v33  ;;  %v1729_v48 = vld [vmem:[#allocation2 + $0x3d0] sm:$0xff]  ;;  %v1731_v25 = vld [vmem:[#allocation2 + $0x3d8] sm:$0xff] }
  0x9d   :  { %1156 = vrcp.f32 %v515_v7  ;;  %v518_v2 = vadd.f32 1.0, %v390_v39  ;;  %v264_v20 = vmul.f32 0.01, %v1694_v53  ;;  %v1139_v61 = vpop.eup %1138  ;;  %887 = vst [vmem:[#allocation5 + $0x300] sm:$0xff] %v728_v3  ;;  %v732_v15 = vmul.f32 %v1137_v0, %v1631_v37  ;;  %v1735_v34 = vld [vmem:[#allocation2 + $0x3e0] sm:$0xff] }
  0x9e   :  { %1158 = vrcp.f32 %v516_v47  ;;  %v519_v43 = vadd.f32 1.0, %v391_v57  ;;  %v265_v54 = vmul.f32 0.01, %v1697_v41  ;;  %v1141_v6 = vpop.eup %1140  ;;  %888 = vst [vmem:[#allocation5 + $0x308] sm:$0xff] %v730_v51  ;;  %v734_v33 = vmul.f32 %v1139_v61, %v1635_v8 }
  0x9f   :  { %1160 = vrcp.f32 %v517_v4  ;;  %v392_v36 = vand.u32 2147483647, %v264_v20  ;;  %v266_v63 = vmul.f32 0.01, %v1700_v27  ;;  %889 = vst [vmem:[#allocation5 + $0x310] sm:$0xff] %v732_v15  ;;  %v736_v28 = vmul.f32 %v1141_v6, %v1640_v22  ;;  %v1719_v22 = vld [vmem:[#allocation2 + $0x3b8] sm:$0xff] }
  0xa0   :  { %1162 = vrcp.f32 %v518_v2  ;;  %v393_v37 = vand.u32 2147483647, %v265_v54  ;;  %v267_v13 = vmul.f32 0.01, %v1704_v59  ;;  %890 = vst [vmem:[#allocation5 + $0x318] sm:$0xff] %v734_v33  ;;  %v1743_v33 = vld [vmem:[#allocation2 + $0x3e8] sm:$0xff] }
  0xa1   :  { %v1143_v46 = vpop.eup %1142  ;;  %1164 = vrcp.f32 %v519_v43  ;;  %v520_v58 = vadd.f32 1.0, %v392_v36  ;;  %v394_v29 = vand.u32 2147483647, %v266_v63  ;;  %v268_v8 = vmul.f32 0.01, %v1708_v16  ;;  %891 = vst [vmem:[#allocation5 + $0x320] sm:$0xff] %v736_v28 }
  0xa2   :  { %v1145_v23 = vpop.eup %1144  ;;  %v738_v35 = vmul.f32 %v1143_v46, %v1647_v19  ;;  %v521_v9 = vadd.f32 1.0, %v393_v37  ;;  %v395_v11 = vand.u32 2147483647, %v267_v13  ;;  %v269_v14 = vmul.f32 0.01, %v1712_v55  ;;  %v1746_v13 = vld [vmem:[#allocation2 + $0x3f0] sm:$0xff] }
  0xa3   :  { %v1147_v18 = vpop.eup %1146  ;;  %v740_v32 = vmul.f32 %v1145_v23, %v1650_v10  ;;  %1166 = vrcp.f32 %v520_v58  ;;  %v522_v5 = vadd.f32 1.0, %v394_v29  ;;  %v396_v26 = vand.u32 2147483647, %v268_v8  ;;  %v1748_v46 = vld [vmem:[#allocation2 + $0x3f8] sm:$0xff] }
  0xa4   :  { %v1149_v30 = vpop.eup %1148  ;;  %892 = vst [vmem:[#allocation5 + $0x328] sm:$0xff] %v738_v35  ;;  %v742_v42 = vmul.f32 %v1147_v18, %v1653_v49  ;;  %1168 = vrcp.f32 %v521_v9  ;;  %v523_v19 = vadd.f32 1.0, %v395_v11  ;;  %v397_v56 = vand.u32 2147483647, %v269_v14 }
  0xa5   :  { %v1151_v24 = vpop.eup %1150  ;;  %893 = vst [vmem:[#allocation5 + $0x330] sm:$0xff] %v740_v32  ;;  %v744_v40 = vmul.f32 %v1149_v30, %v1657_v31  ;;  %1170 = vrcp.f32 %v522_v5  ;;  %v524_v10 = vadd.f32 1.0, %v396_v26  ;;  %v270_v52 = vmul.f32 0.01, %v1719_v22 }
  0xa6   :  { %v1153_v7 = vpop.eup %1152  ;;  %894 = vst [vmem:[#allocation5 + $0x338] sm:$0xff] %v742_v42  ;;  %v746_v49 = vmul.f32 %v1151_v24, %v1659_v45  ;;  %1172 = vrcp.f32 %v523_v19  ;;  %v525_v47 = vadd.f32 1.0, %v397_v56  ;;  %v271_v39 = vmul.f32 0.01, %v1722_v17 }
  0xa7   :  { %895 = vst [vmem:[#allocation5 + $0x340] sm:$0xff] %v744_v40  ;;  %v748_v31 = vmul.f32 %v1153_v7, %v1663_v60  ;;  %1174 = vrcp.f32 %v524_v10  ;;  %v398_v3 = vand.u32 2147483647, %v270_v52  ;;  %v272_v4 = vmul.f32 0.01, %v1725_v21 }
  0xa8   :  { %896 = vst [vmem:[#allocation5 + $0x348] sm:$0xff] %v746_v49  ;;  %1176 = vrcp.f32 %v525_v47  ;;  %v399_v57 = vand.u32 2147483647, %v271_v39  ;;  %v273_v0 = vmul.f32 0.01, %v1729_v48 }
  0xa9   :  { %v274_v45 = vmul.f32 0.01, %v1731_v25  ;;  %v1155_v51 = vpop.eup %1154  ;;  %897 = vst [vmem:[#allocation5 + $0x350] sm:$0xff] %v748_v31  ;;  %v526_v2 = vadd.f32 1.0, %v398_v3  ;;  %v400_v20 = vand.u32 2147483647, %v272_v4 }
  0xaa   :  { %v275_v61 = vmul.f32 0.01, %v1735_v34  ;;  %v1157_v15 = vpop.eup %1156  ;;  %v750_v60 = vmul.f32 %v1155_v51, %v1671_v50  ;;  %v527_v43 = vadd.f32 1.0, %v399_v57  ;;  %v401_v54 = vand.u32 2147483647, %v273_v0 }
  0xab   :  { %v402_v6 = vand.u32 2147483647, %v274_v45  ;;  %v1159_v36 = vpop.eup %1158  ;;  %v752_v63 = vmul.f32 %v1157_v15, %v1674_v44  ;;  %1178 = vrcp.f32 %v526_v2  ;;  %v528_v28 = vadd.f32 1.0, %v400_v20 }
  0xac   :  { %v403_v37 = vand.u32 2147483647, %v275_v61  ;;  %v1161_v58 = vpop.eup %1160  ;;  %898 = vst [vmem:[#allocation5 + $0x358] sm:$0xff] %v750_v60  ;;  %v754_v29 = vmul.f32 %v1159_v36, %v1676_v12  ;;  %1180 = vrcp.f32 %v527_v43  ;;  %v529_v50 = vadd.f32 1.0, %v401_v54 }
  0xad   :  { %v530_v8 = vadd.f32 1.0, %v402_v6  ;;  %v1163_v23 = vpop.eup %1162  ;;  %899 = vst [vmem:[#allocation5 + $0x360] sm:$0xff] %v752_v63  ;;  %v756_v35 = vmul.f32 %v1161_v58, %v1679_v62  ;;  %1182 = vrcp.f32 %v528_v28  ;;  %v276_v9 = vmul.f32 0.01, %v1743_v33 }
  0xae   :  { %v531_v44 = vadd.f32 1.0, %v403_v37  ;;  %v1165_v11 = vpop.eup %1164  ;;  %900 = vst [vmem:[#allocation5 + $0x368] sm:$0xff] %v754_v29  ;;  %v758_v14 = vmul.f32 %v1163_v23, %v1683_v38  ;;  %1184 = vrcp.f32 %v529_v50  ;;  %v277_v18 = vmul.f32 0.01, %v1746_v13 }
  0xaf   :  { %v278_v12 = vmul.f32 0.01, %v1748_v46  ;;  %901 = vst [vmem:[#allocation5 + $0x370] sm:$0xff] %v756_v35  ;;  %v760_v32 = vmul.f32 %v1165_v11, %v1688_v1  ;;  %1186 = vrcp.f32 %v530_v8  ;;  %v404_v5 = vand.u32 2147483647, %v276_v9 }
  0xb0   :  { %v1167_v26 = vpop.eup %1166  ;;  %902 = vst [vmem:[#allocation5 + $0x378] sm:$0xff] %v758_v14  ;;  %1188 = vrcp.f32 %v531_v44  ;;  %v405_v62 = vand.u32 2147483647, %v277_v18 }
  0xb1   :  { %v406_v30 = vand.u32 2147483647, %v278_v12  ;;  %v1169_v42 = vpop.eup %1168  ;;  %903 = vst [vmem:[#allocation5 + $0x380] sm:$0xff] %v760_v32  ;;  %v762_v19 = vmul.f32 %v1167_v26, %v1694_v53  ;;  %v532_v38 = vadd.f32 1.0, %v404_v5 }
  0xb2   :  { %v1171_v56 = vpop.eup %1170  ;;  %v764_v24 = vmul.f32 %v1169_v42, %v1697_v41  ;;  %v533_v40 = vadd.f32 1.0, %v405_v62 }
  0xb3   :  { %v534_v10 = vadd.f32 1.0, %v406_v30  ;;  %v1173_v52 = vpop.eup %1172  ;;  %904 = vst [vmem:[#allocation5 + $0x388] sm:$0xff] %v762_v19  ;;  %v766_v1 = vmul.f32 %v1171_v56, %v1700_v27  ;;  %1190 = vrcp.f32 %v532_v38 }
  0xb4   :  { %v1175_v7 = vpop.eup %1174  ;;  %905 = vst [vmem:[#allocation5 + $0x390] sm:$0xff] %v764_v24  ;;  %v768_v49 = vmul.f32 %v1173_v52, %v1704_v59  ;;  %1192 = vrcp.f32 %v533_v40 }
  0xb5   :  { %v1177_v47 = vpop.eup %1176  ;;  %906 = vst [vmem:[#allocation5 + $0x398] sm:$0xff] %v766_v1  ;;  %v770_v53 = vmul.f32 %v1175_v7, %v1708_v16  ;;  %1194 = vrcp.f32 %v534_v10 }
  0xb6   :  { %907 = vst [vmem:[#allocation5 + $0x3a0] sm:$0xff] %v768_v49  ;;  %v772_v41 = vmul.f32 %v1177_v47, %v1712_v55 }
  0xb7   :  { %908 = vst [vmem:[#allocation5 + $0x3a8] sm:$0xff] %v770_v53 }
  0xb8   :  { %v1179_v39 = vpop.eup %1178  ;;  %909 = vst [vmem:[#allocation5 + $0x3b0] sm:$0xff] %v772_v41 }
  0xb9   :  { %v1181_v31 = vpop.eup %1180  ;;  %v774_v27 = vmul.f32 %v1179_v39, %v1719_v22 }
  0xba   :  { %v1183_v3 = vpop.eup %1182  ;;  %v776_v4 = vmul.f32 %v1181_v31, %v1722_v17 }
  0xbb   :  { %v1185_v57 = vpop.eup %1184  ;;  %910 = vst [vmem:[#allocation5 + $0x3b8] sm:$0xff] %v774_v27  ;;  %v778_v59 = vmul.f32 %v1183_v3, %v1725_v21 }
  0xbc   :  { %v1187_v0 = vpop.eup %1186  ;;  %911 = vst [vmem:[#allocation5 + $0x3c0] sm:$0xff] %v776_v4  ;;  %v780_v16 = vmul.f32 %v1185_v57, %v1729_v48 }
  0xbd   :  { %v1189_v45 = vpop.eup %1188  ;;  %912 = vst [vmem:[#allocation5 + $0x3c8] sm:$0xff] %v778_v59  ;;  %v782_v55 = vmul.f32 %v1187_v0, %v1731_v25 }
  0xbe   :  { %913 = vst [vmem:[#allocation5 + $0x3d0] sm:$0xff] %v780_v16  ;;  %v784_v51 = vmul.f32 %v1189_v45, %v1735_v34 }
  0xbf   :  { %914 = vst [vmem:[#allocation5 + $0x3d8] sm:$0xff] %v782_v55 }
  0xc0   :  { %v1191_v22 = vpop.eup %1190  ;;  %915 = vst [vmem:[#allocation5 + $0x3e0] sm:$0xff] %v784_v51 }
  0xc1   :  { %v1193_v17 = vpop.eup %1192  ;;  %v786_v2 = vmul.f32 %v1191_v22, %v1743_v33 }
  0xc2   :  { %v1195_v21 = vpop.eup %1194  ;;  %v788_v20 = vmul.f32 %v1193_v17, %v1746_v13 }
  0xc3   :  { %916 = vst [vmem:[#allocation5 + $0x3e8] sm:$0xff] %v786_v2  ;;  %v790_v48 = vmul.f32 %v1195_v21, %v1748_v46 }
  0xc4   :  { %917 = vst [vmem:[#allocation5 + $0x3f0] sm:$0xff] %v788_v20 }
  0xc5   :  { %918 = vst [vmem:[#allocation5 + $0x3f8] sm:$0xff] %v790_v48 }
  0xc6   :  { %1227 = shalt.err (!%p1224_p9)
}
  0xc7   :  { %930 = dma.vmem_to_hbm [thread:$0]  %s925_s13, 16384, %s1779_s1, [#allocation4], %s1241_s9, %s1241_s9, %s1242_s10  }
  0xc8   :  { %1238 = dma.done.wait [#allocation4], 16384  }
  0xc9   :  { %1239 = vsyncadd [#allocation4], 4294950912 }
  0xca   :  { %934 = vsyncpa [#allocation3], 1 }
  0xcb   :  { %935 = vsyncpa [#allocation4], 1 }

</bundles_post_ra>
